<compile_context>
chip_gen: v7x
topology: tpu7x:2x2x1
jax: 0.10.0
libtpu: 0.0.40
codegen_flags: <defaults>
</compile_context>

<pallas_src>
import functools

import jax
import jax.numpy as jnp
from jax.experimental import pallas as pl
from jax.experimental.pallas import tpu as pltpu

_LANES = 128
_SUBLANES = 8


def _dice_kernel(out_ref, tgt_ref, acc_ref, *, total_pixels, needs_mask):
    """Grid = (batch, pixel_chunk, row_tile); the reduction axis (row_tile) is last."""
    j = pl.program_id(2)

    @pl.when(j == 0)
    def _init():
        acc_ref[...] = jnp.zeros_like(acc_ref)

    logits = out_ref[0].astype(jnp.float32)   # (tile_rows, 128)
    tgt = tgt_ref[0].astype(jnp.float32)      # (tile_rows, 128)
    p = jax.nn.sigmoid(logits)

    tile_rows = logits.shape[0]

    if needs_mask:
        # Zero every slot whose *logical* flattened-pixel index is >= the true
        # pixel count.  This covers the 128-lane tail, the ragged last row-tile
        # (whose out-of-bounds rows hold unspecified data) and whole tiles that
        # exist only because the pixel-chunk axis overshoots.  jnp.where-select
        # is NaN-safe for the masked-out garbage.
        c = pl.program_id(1)
        row0 = (c * pl.num_programs(2) + j) * tile_rows
        rows = jax.lax.broadcasted_iota(jnp.int32, (tile_rows, _LANES), 0)
        lanes = jax.lax.broadcasted_iota(jnp.int32, (tile_rows, _LANES), 1)
        elem = (rows + row0) * _LANES + lanes
        valid = elem < total_pixels
        p = jnp.where(valid, p, 0.0)
        tgt = jnp.where(valid, tgt, 0.0)

    # Fold the tile to (8, 128) with pure vreg adds (sublane-major reshape is
    # layout-preserving); the cross-sublane/lane reduce is deferred to the wrapper.
    groups = tile_rows // _SUBLANES
    inter8 = (p * tgt).reshape(groups, _SUBLANES, _LANES).sum(axis=0)
    psum8 = p.reshape(groups, _SUBLANES, _LANES).sum(axis=0)
    tsum8 = tgt.reshape(groups, _SUBLANES, _LANES).sum(axis=0)

    # Accumulate directly into the (resident) lane-dense output block.
    acc_ref[0, 0, 0] += inter8
    acc_ref[0, 0, 1] += psum8
    acc_ref[0, 0, 2] += tsum8


def dice_loss(output, target, *, tile_rows: int = 1024, pixel_chunks=None):
    """output: (N, 1, H, W) logits; target: (N, H, W). Returns scalar loss.sum()."""
    n = output.shape[0]
    out2 = output.reshape(n, -1)      # native dtype: f32 cast happens in-kernel
    tgt2 = target.reshape(n, -1)
    p = out2.shape[1]
    assert tgt2.shape[1] == p, "output.flatten(1) and target.flatten(1) must match"

    # Lane-dense layout: pixel axis -> (rows, 128).  Pad (one small copy) only
    # when the reshape needs it (P % 128 != 0) or the image is tiny (< 32 rows);
    # large, nicely-sized inputs pass through zero-copy.  Pad values are
    # irrelevant: the kernel masks on the true pixel count.
    r = -(-p // _LANES)
    r_eff = r if r >= 32 else 32
    p_eff = r_eff * _LANES
    if p_eff != p:
        out2 = jnp.pad(out2, ((0, 0), (0, p_eff - p)))
        tgt2 = jnp.pad(tgt2, ((0, 0), (0, p_eff - p)))
    out3 = out2.reshape(n, r_eff, _LANES)
    tgt3 = tgt2.reshape(n, r_eff, _LANES)

    # tile_rows: multiple of 32, never larger than the data, hard-capped at 4096
    # so the double-buffered footprint stays under v5e's 16 MiB scoped VMEM.
    req = max(32, (int(tile_rows) // 32) * 32)
    tile_rows = min(req, (r_eff // 32) * 32, 4096)

    n_blocks = -(-r_eff // tile_rows)

    # Optional pixel-chunk axis: gives v7x's second TensorCore work when the
    # batch axis alone cannot be split (N == 1).  No-op on v5e/v6e.
    if pixel_chunks is None:
        pixel_chunks = 2 if n == 1 else 1
    n_chunks = max(1, min(int(pixel_chunks), n_blocks))
    tiles_per_chunk = -(-n_blocks // n_chunks)

    # Mask only when the grid covers more logical pixels than really exist.
    needs_mask = (n_chunks * tiles_per_chunk * tile_rows * _LANES) != p

    kernel = functools.partial(_dice_kernel, total_pixels=p, needs_mask=needs_mask)

    def in_map(b, c, j):
        # Clamp so the DMA never targets a fully out-of-bounds block; the
        # kernel's logical-index mask zeroes redundant / ragged rows.
        return (b, jnp.minimum(c * tiles_per_chunk + j, n_blocks - 1), 0)

    parts = pl.pallas_call(
        kernel,
        out_shape=jax.ShapeDtypeStruct((n, n_chunks, 3, _SUBLANES, _LANES), jnp.float32),
        grid_spec=pltpu.PrefetchScalarGridSpec(
            num_scalar_prefetch=0,
            grid=(n, n_chunks, tiles_per_chunk),
            in_specs=[
                pl.BlockSpec((1, tile_rows, _LANES), in_map),
                pl.BlockSpec((1, tile_rows, _LANES), in_map),
            ],
            out_specs=pl.BlockSpec(
                (1, 1, 3, _SUBLANES, _LANES), lambda b, c, j: (b, c, 0, 0, 0)
            ),
        ),
        compiler_params=pltpu.CompilerParams(
            # batch & pixel-chunk axes parallel (megacore split on v7x),
            # row-tile reduction axis arbitrary and last.
            dimension_semantics=("parallel", "parallel", "arbitrary"),
        ),
    )(out3, tgt3)

    # Tiny wrapper-side finish: combine chunks + per-lane partials, then the loss.
    sums = jnp.sum(parts, axis=(1, 3, 4))                 # (n, 3) f32
    inter, psum, tsum = sums[:, 0], sums[:, 1], sums[:, 2]
    loss = 1.0 - (2.0 * inter + 1.0) / (psum + tsum + 1.0)
    return jnp.sum(loss)


def dice_loss_ref(output, target):
    """Pure-JAX reference mirroring the PyTorch forward exactly."""
    n = output.shape[0]
    p = jax.nn.sigmoid(output.astype(jnp.float32)).reshape(n, -1)
    t = target.astype(jnp.float32).reshape(n, -1)
    numerator = 2.0 * jnp.sum(p * t, axis=1)
    denominator = jnp.sum(p, axis=-1) + jnp.sum(t, axis=-1)
    loss = 1.0 - (numerator + 1.0) / (denominator + 1.0)
    return jnp.sum(loss)


if __name__ == "__main__":
    key = jax.random.PRNGKey(0)

    # Primary small case from the module spec, plus a ragged pixel count and a
    # multi-tile / 2-way pixel-chunk case (exercises the clamped index map).
    cases = [
        ((2, 1, 16, 16), dict()),
        ((1, 1, 13, 13), dict()),
        ((1, 1, 96, 96), dict(tile_rows=32, pixel_chunks=2)),
    ]
    for shape, kwargs in cases:
        n, c, h, w = shape
        key, k1, k2 = jax.random.split(key, 3)
        output = jax.random.normal(k1, (n, c, h, w), dtype=jnp.float32)          # logits
        target = (jax.random.uniform(k2, (n, h, w)) > 0.5).astype(jnp.float32)   # binary mask

        got = jax.block_until_ready(dice_loss(output, target, **kwargs))
        want = jax.block_until_ready(dice_loss_ref(output, target))
        assert jnp.allclose(got, want, rtol=1e-5, atol=1e-5), (shape, got, want)

    print("KERNEL_OK")
</pallas_src>

<mosaic_0001>
module attributes {stable_mosaic.version = 11 : i64} {
  func.func @_dice_kernel(%arg0: i32, %arg1: i32, %arg2: i32, %arg3: memref<1x32x128xf32, #tpu.memory_space<vmem>>, %arg4: memref<1x32x128xf32, #tpu.memory_space<vmem>>, %arg5: memref<1x1x3x8x128xf32, #tpu.memory_space<vmem>>) attributes {dimension_semantics = [#tpu.dimension_semantics<parallel>, #tpu.dimension_semantics<parallel>, #tpu.dimension_semantics<arbitrary>], iteration_bounds = array<i64: 2, 1, 1>, scalar_prefetch = 0 : i64, scratch_operands = 0 : i64, tpu.core_type = #tpu.core_type<tc>, window_params = [{transform_indices = @transform_0, window_bounds = array<i64: 1, 32, 128>}, {transform_indices = @transform_1, window_bounds = array<i64: 1, 32, 128>}, {transform_indices = @transform_2, window_bounds = array<i64: 1, 1, 3, 8, 128>}]} {
    %c0_i32 = arith.constant 0 : i32
    %0 = arith.cmpi eq, %arg2, %c0_i32 : i32
    %1 = arith.extui %0 : i1 to i32
    %c0_i32_0 = arith.constant 0 : i32
    %2 = arith.cmpi ne, %1, %c0_i32_0 : i32
    scf.if %2 {
      %cst_39 = arith.constant 0.000000e+00 : f32
      %53 = vector.broadcast %cst_39 : f32 to vector<1x1x3x8x128xf32>
      %c0_40 = arith.constant 0 : index
      %c0_41 = arith.constant 0 : index
      %c0_42 = arith.constant 0 : index
      %c0_43 = arith.constant 0 : index
      %c0_44 = arith.constant 0 : index
      %54 = vector.load %arg5[%c0_40, %c0_41, %c0_42, %c0_43, %c0_44] : memref<1x1x3x8x128xf32, #tpu.memory_space<vmem>>, vector<1x1x3x8x128xf32>
      tpu.vector_store %arg5[%c0_40, %c0_41, %c0_42, %c0_43, %c0_44], %53 {strides = array<i32>} : memref<1x1x3x8x128xf32, #tpu.memory_space<vmem>>, vector<1x1x3x8x128xf32>,
    } else {
    }
    %c0 = arith.constant 0 : index
    %c0_1 = arith.constant 0 : index
    %c0_2 = arith.constant 0 : index
    %3 = vector.load %arg3[%c0, %c0_1, %c0_2] : memref<1x32x128xf32, #tpu.memory_space<vmem>>, vector<1x32x128xf32>
    %4 = vector.shape_cast %3 : vector<1x32x128xf32> to vector<32x128xf32>
    %c0_3 = arith.constant 0 : index
    %c0_4 = arith.constant 0 : index
    %c0_5 = arith.constant 0 : index
    %5 = vector.load %arg4[%c0_3, %c0_4, %c0_5] : memref<1x32x128xf32, #tpu.memory_space<vmem>>, vector<1x32x128xf32>
    %6 = vector.shape_cast %5 : vector<1x32x128xf32> to vector<32x128xf32>
    %7 = arith.negf %4 : vector<32x128xf32>
    %8 = math.exp %7 : vector<32x128xf32>
    %cst = arith.constant 1.000000e+00 : f32
    %9 = vector.broadcast %cst : f32 to vector<32x128xf32>
    %10 = arith.addf %9, %8 : vector<32x128xf32>
    %11 = arith.divf %9, %10 : vector<32x128xf32>
    %c1_i32 = arith.constant 1 : i32
    %12 = arith.muli %arg1, %c1_i32 : i32
    %13 = arith.addi %12, %arg2 : i32
    %c32_i32 = arith.constant 32 : i32
    %14 = arith.muli %13, %c32_i32 : i32
    %15 = tpu.iota {dimensions = array<i32: 0>} : vector<32x128xi32>
    %16 = tpu.iota {dimensions = array<i32: 1>} : vector<32x128xi32>
    %17 = vector.broadcast %14 : i32 to vector<32x128xi32>
    %18 = arith.addi %15, %17 : vector<32x128xi32>
    %c128_i32 = arith.constant 128 : i32
    %19 = vector.broadcast %c128_i32 : i32 to vector<32x128xi32>
    %20 = arith.muli %18, %19 : vector<32x128xi32>
    %21 = arith.addi %20, %16 : vector<32x128xi32>
    %c256_i32 = arith.constant 256 : i32
    %22 = vector.broadcast %c256_i32 : i32 to vector<32x128xi32>
    %23 = arith.cmpi slt, %21, %22 : vector<32x128xi32>
    %cst_6 = arith.constant 0.000000e+00 : f32
    %24 = vector.broadcast %cst_6 : f32 to vector<32x128xf32>
    %25 = arith.select %23, %11, %24 : vector<32x128xi1>, vector<32x128xf32>
    %cst_7 = arith.constant 0.000000e+00 : f32
    %26 = vector.broadcast %cst_7 : f32 to vector<32x128xf32>
    %27 = arith.select %23, %6, %26 : vector<32x128xi1>, vector<32x128xf32>
    %28 = arith.mulf %25, %27 : vector<32x128xf32>
    %29 = vector.shape_cast %28 : vector<32x128xf32> to vector<4x8x128xf32>
    %cst_8 = arith.constant dense<0.000000e+00> : vector<8x128xf32>
    %30 = vector.multi_reduction <add>, %29, %cst_8 [0] : vector<4x8x128xf32> to vector<8x128xf32>
    %31 = vector.shape_cast %25 : vector<32x128xf32> to vector<4x8x128xf32>
    %cst_9 = arith.constant dense<0.000000e+00> : vector<8x128xf32>
    %32 = vector.multi_reduction <add>, %31, %cst_9 [0] : vector<4x8x128xf32> to vector<8x128xf32>
    %33 = vector.shape_cast %27 : vector<32x128xf32> to vector<4x8x128xf32>
    %cst_10 = arith.constant dense<0.000000e+00> : vector<8x128xf32>
    %34 = vector.multi_reduction <add>, %33, %cst_10 [0] : vector<4x8x128xf32> to vector<8x128xf32>
    %c0_11 = arith.constant 0 : index
    %c0_12 = arith.constant 0 : index
    %c0_13 = arith.constant 0 : index
    %c0_14 = arith.constant 0 : index
    %c0_15 = arith.constant 0 : index
    %35 = vector.load %arg5[%c0_11, %c0_12, %c0_13, %c0_14, %c0_15] : memref<1x1x3x8x128xf32, #tpu.memory_space<vmem>>, vector<1x1x1x8x128xf32>
    %36 = vector.shape_cast %35 : vector<1x1x1x8x128xf32> to vector<8x128xf32>
    %37 = arith.addf %36, %30 : vector<8x128xf32>
    %c0_16 = arith.constant 0 : index
    %c0_17 = arith.constant 0 : index
    %c0_18 = arith.constant 0 : index
    %c0_19 = arith.constant 0 : index
    %c0_20 = arith.constant 0 : index
    %38 = vector.load %arg5[%c0_16, %c0_17, %c0_18, %c0_19, %c0_20] : memref<1x1x3x8x128xf32, #tpu.memory_space<vmem>>, vector<1x1x1x8x128xf32>
    %39 = vector.shape_cast %38 : vector<1x1x1x8x128xf32> to vector<8x128xf32>
    %40 = vector.shape_cast %37 : vector<8x128xf32> to vector<1x1x1x8x128xf32>
    tpu.vector_store %arg5[%c0_16, %c0_17, %c0_18, %c0_19, %c0_20], %40 {strides = array<i32>} : memref<1x1x3x8x128xf32, #tpu.memory_space<vmem>>, vector<1x1x1x8x128xf32>,
    %c0_21 = arith.constant 0 : index
    %c0_22 = arith.constant 0 : index
    %c1 = arith.constant 1 : index
    %c0_23 = arith.constant 0 : index
    %c0_24 = arith.constant 0 : index
    %41 = vector.load %arg5[%c0_21, %c0_22, %c1, %c0_23, %c0_24] : memref<1x1x3x8x128xf32, #tpu.memory_space<vmem>>, vector<1x1x1x8x128xf32>
    %42 = vector.shape_cast %41 : vector<1x1x1x8x128xf32> to vector<8x128xf32>
    %43 = arith.addf %42, %32 : vector<8x128xf32>
    %c0_25 = arith.constant 0 : index
    %c0_26 = arith.constant 0 : index
    %c1_27 = arith.constant 1 : index
    %c0_28 = arith.constant 0 : index
    %c0_29 = arith.constant 0 : index
    %44 = vector.load %arg5[%c0_25, %c0_26, %c1_27, %c0_28, %c0_29] : memref<1x1x3x8x128xf32, #tpu.memory_space<vmem>>, vector<1x1x1x8x128xf32>
    %45 = vector.shape_cast %44 : vector<1x1x1x8x128xf32> to vector<8x128xf32>
    %46 = vector.shape_cast %43 : vector<8x128xf32> to vector<1x1x1x8x128xf32>
    tpu.vector_store %arg5[%c0_25, %c0_26, %c1_27, %c0_28, %c0_29], %46 {strides = array<i32>} : memref<1x1x3x8x128xf32, #tpu.memory_space<vmem>>, vector<1x1x1x8x128xf32>,
    %c0_30 = arith.constant 0 : index
    %c0_31 = arith.constant 0 : index
    %c2 = arith.constant 2 : index
    %c0_32 = arith.constant 0 : index
    %c0_33 = arith.constant 0 : index
    %47 = vector.load %arg5[%c0_30, %c0_31, %c2, %c0_32, %c0_33] : memref<1x1x3x8x128xf32, #tpu.memory_space<vmem>>, vector<1x1x1x8x128xf32>
    %48 = vector.shape_cast %47 : vector<1x1x1x8x128xf32> to vector<8x128xf32>
    %49 = arith.addf %48, %34 : vector<8x128xf32>
    %c0_34 = arith.constant 0 : index
    %c0_35 = arith.constant 0 : index
    %c2_36 = arith.constant 2 : index
    %c0_37 = arith.constant 0 : index
    %c0_38 = arith.constant 0 : index
    %50 = vector.load %arg5[%c0_34, %c0_35, %c2_36, %c0_37, %c0_38] : memref<1x1x3x8x128xf32, #tpu.memory_space<vmem>>, vector<1x1x1x8x128xf32>
    %51 = vector.shape_cast %50 : vector<1x1x1x8x128xf32> to vector<8x128xf32>
    %52 = vector.shape_cast %49 : vector<8x128xf32> to vector<1x1x1x8x128xf32>
    tpu.vector_store %arg5[%c0_34, %c0_35, %c2_36, %c0_37, %c0_38], %52 {strides = array<i32>} : memref<1x1x3x8x128xf32, #tpu.memory_space<vmem>>, vector<1x1x1x8x128xf32>,
    return
  }
  func.func @transform_0(%arg0: i32, %arg1: i32, %arg2: i32) -> (i32, i32, i32) {
    %c1_i32 = arith.constant 1 : i32
    %0 = arith.muli %arg1, %c1_i32 : i32
    %1 = arith.addi %0, %arg2 : i32
    %c0_i32 = arith.constant 0 : i32
    %2 = arith.minsi %1, %c0_i32 : i32
    %c0_i32_0 = arith.constant 0 : i32
    %c0_i32_1 = arith.constant 0 : i32
    return %arg0, %2, %c0_i32_0 : i32, i32, i32
  }
  func.func @transform_1(%arg0: i32, %arg1: i32, %arg2: i32) -> (i32, i32, i32) {
    %c1_i32 = arith.constant 1 : i32
    %0 = arith.muli %arg1, %c1_i32 : i32
    %1 = arith.addi %0, %arg2 : i32
    %c0_i32 = arith.constant 0 : i32
    %2 = arith.minsi %1, %c0_i32 : i32
    %c0_i32_0 = arith.constant 0 : i32
    %c0_i32_1 = arith.constant 0 : i32
    return %arg0, %2, %c0_i32_0 : i32, i32, i32
  }
  func.func @transform_2(%arg0: i32, %arg1: i32, %arg2: i32) -> (i32, i32, i32, i32, i32) {
    %c0_i32 = arith.constant 0 : i32
    %c0_i32_0 = arith.constant 0 : i32
    %c0_i32_1 = arith.constant 0 : i32
    %c0_i32_2 = arith.constant 0 : i32
    return %arg0, %arg1, %c0_i32, %c0_i32_0, %c0_i32_1 : i32, i32, i32, i32, i32
  }
}

</mosaic_0001>

<bundles_post_ra>
// kernel: tpu_custom_call.1
= control target key start
LH: loop header
LB: loop body
LE: loop exit
PB: predicated region body
PF: predicated region fallthrough
CT: control target
= control target key end

     0   :  { %7 = vsyncpa [#allocation3], 0  ;;  %s1029_s0 = inlined_call_operand.hbm [shape: f32[2,32,128], index: 0, kind: input, shape index: {}]   ;;  %s1030_s1 = inlined_call_operand.hbm [shape: f32[2,32,128], index: 1, kind: input, shape index: {}]   ;;  %s1031_s2 = inlined_call_operand.hbm [shape: f32[2,1,3,8,128], index: 2, kind: output, shape index: {}]  }
   0x1   :  { %9 = vsyncpa [#allocation3 + $0x1], 0 }
   0x2   :  { %10 = vsyncpa [#allocation6], 0 }
   0x3   :  { %12 = vsyncpa [#allocation6 + $0x1], 0 }
   0x4   :  { %13 = vsyncpa [#allocation4], 0 }
   0x5   :  { %15 = vsyncpa [#allocation4 + $0x1], 0  ;;  %s772_s9 = smov 0   ;;  %s774_s10 = smov 0  }
   0x6   :  { %s776_s11 = smov 0   ;;  %s778_s12 = smov 0  }
   0x7   :  { %s780_s13 = smov 0   ;;  %s782_s14 = smov 0  }
   0x8 LB: > { %s486_s15 = sadd.s32 4294967295, %s748_s14   ;;  %s487_s16 = sadd.s32 4294967294, %s748_s14   ;;  %s748_s14 = sphi %s782_s14, %s21_s14   ;;  %s744_s13 = sphi %s780_s13, %s1049_s13   ;;  %s740_s12 = sphi %s778_s12, %s1048_s12   ;;  %s736_s11 = sphi %s776_s11, %s1047_s11   ;;  %s732_s10 = sphi %s774_s10, %s1046_s10   ;;  %s728_s9 = sphi %s772_s9, %s1045_s9  }
   0x9   : > { %s40_s17 = sadd.s32 1, %s744_s13  ;;  %s55_s18 = sadd.s32 1, %s736_s11 }
   0xa   : > { %p42_p0 = scmp.ge.s32.totalorder %s40_s17, 2  ;;  %p62_p1 = scmp.ne.s32.totalorder %s736_s11, %s732_s10 }
   0xb   : > { %p63_p2 = scmp.eq.s32.totalorder %s748_s14, 0  ;;  %p68_p3 = scmp.ne.s32.totalorder %s732_s10, %s728_s9 }
   0xc   : > { %s1051_s17 = smov (%p42_p0, %s40_s17), 0  ;;  %p69_p5 = scmp.eq.s32.totalorder %s486_s15, 0 }
   0xd   : > { %p813_p4 = por %p63_p2, %p62_p1  ;;  %s50_s20 = ssub.s32 %s744_s13, %s1051_s17 }
   0xe   : > { %p128_p6 = scmp.eq.s32.totalorder %s486_s15, 1  ;;  %p53_p7 = scmp.eq.s32.totalorder %s50_s20, 0 }
   0xf   : > { %p819_p8 = por %p69_p5, %p68_p3  ;;  %p134_p10 = scmp.eq.s32.totalorder %s487_s16, 1 }
  0x10   : > { %p823_p9 = por %p128_p6, %p62_p1  ;;  %p531_p13 = scmp.lt.s32.totalorder %s748_s14, 2 }
  0x11   : > { %s1035_s21 = scalar_select %p819_p8, 1, 0 }
  0x12   : > { %s1036_s22 = scalar_select %p823_p9, 1, 0 }
  0x13   : > { %s828_s23 = scalar_select %p53_p7, %s736_s11, %s55_s18  }
  0x14   : > { %p830_p11 = por %p134_p10, %p68_p3  ;;  %s837_s25 = sand.u32 1, %s736_s11  }
  0x15   : > { %s490_s26 = sshll.u32 %s837_s25, 5  ;;  %s510_s27 = sshll.u32 %s744_s13, 9 }
  0x16   : > { %s1037_s24 = scalar_select %p830_p11, 1, 0 }
  0x17   : > { %s846_s30 = scalar_lea.hbm %s1029_s0, %s510_s27  ;;  %s158_s3 = scalar_lea.vmem [#allocation2], %s490_s26 }
  0x18   : > { %s170_s4 = sshll.u32 %s158_s3, 4  ;;  %p854_p0 = pnand %p531_p13, %p813_p4  ;;  %s850_s4 = int_to_ptr.vmem [resolvable:$true] %s170_s4 }
  0x19   : > { %s155_s6 = scalar_lea.sflag [#allocation3], %s837_s25  ;;  %s602_s7 = scalar_lea.hbm %s846_s30, 512 }
  0x1a   : > { %p603_p2 = scmp.ne.s32.totalorder %s846_s30, %s602_s7  ;;  %p604_p3 = pneg %p854_p0 }
  0x1b   : > { %s607_s16 = scalar_lea.hbm %s1029_s0, 1024  ;;  %p608_p4 = scmp.lt.u32.totalorder %s846_s30, %s1029_s0 }
  0x1c   : > { %p605_p5 = pnand %p604_p3, %p603_p2  ;;  %p609_p7 = scmp.lt.u32.totalorder %s607_s16, %s602_s7 }
  0x1d   : > { %p611_p13 = scmp.lt.u32.totalorder %s602_s7, %s846_s30 }
  0x1e   : > { %p606_p6 = pneg %p605_p5  ;;  %p610_p10 = por %p609_p7, %p608_p4 }
  0x20   : > { %p612_p12 = por %p611_p13, %p610_p10 }
  0x22   : > { %p613_p1 = pnand %p612_p12, %p606_p6 }
  0x24   : > { %616 = shalt.err (!%p613_p1)
}
  0x25   : > { %s617_s20 = scalar_lea.vmem %s850_s4, 512  ;;  %s750_s28 = smov [#allocation2]  }
  0x26   : > { %p618_p2 = scmp.ne.s32.totalorder %s850_s4, %s617_s20  ;;  %s622_s29 = sshll.u32 %s750_s28, 4  ;;  %s623_s29 = int_to_ptr.vmem [resolvable:$false] %s622_s29 }
  0x27   : > { %s624_s3 = scalar_lea.vmem %s623_s29, 1024  ;;  %p625_p9 = scmp.lt.s32.totalorder %s850_s4, %s623_s29 }
  0x28   : > { %p620_p5 = pnand %p618_p2, %p604_p3  ;;  %p626_p4 = scmp.lt.s32.totalorder %s624_s3, %s617_s20 }
  0x2a   : > { %p621_p11 = pneg %p620_p5  ;;  %p627_p7 = por %p626_p4, %p625_p9 }
  0x2c   : > { %p628_p10 = pnand %p627_p7, %p621_p11 }
  0x2e   : > { %631 = shalt.err (!%p628_p10)
}
  0x2f   : > { %s751_s7 = smov 128   ;;  %s752_s8 = smov 8  }
  0x30   : > { %523 = dma.hbm_to_vmem [thread:$0]  (!%p854_p0), %s846_s30, 512, %s850_s4, %s155_s6, %s751_s7, %s751_s7, %s752_s8  }
  0x31   : > { %p204_p9 = scmp.lt.s32.totalorder %s748_s14, 3  ;;  %s896_s18 = scalar_lea.hbm %s1030_s1, %s510_s27 }
  0x32   : > { %p1039_p11 = scmp.ge.s32.totalorder %s748_s14, 1  ;;  %s184_s20 = scalar_lea.vmem [#allocation5], %s490_s26 }
  0x33   : > { %s196_s28 = sshll.u32 %s184_s20, 4  ;;  %s181_s30 = scalar_lea.sflag [#allocation6], %s837_s25  ;;  %s906_s28 = int_to_ptr.vmem [resolvable:$true] %s196_s28 }
  0x34   : > { %p900_p12 = pnand %p1039_p11, %p204_p9  ;;  %s632_s4 = scalar_lea.hbm %s896_s18, 512 }
  0x35   : > { %p633_p1 = scmp.ne.s32.totalorder %s896_s18, %s632_s4  ;;  %s637_s29 = scalar_lea.hbm %s1030_s1, 1024 }
  0x36   : > { %p638_p2 = scmp.lt.u32.totalorder %s896_s18, %s1030_s1  ;;  %p639_p5 = scmp.lt.u32.totalorder %s637_s29, %s632_s4 }
  0x37   : > { %p635_p6 = pnand %p633_p1, %p604_p3  ;;  %p641_p7 = scmp.lt.u32.totalorder %s632_s4, %s896_s18 }
  0x38   : > { %p640_p4 = por %p639_p5, %p638_p2 }
  0x39   : > { %p636_p13 = pneg %p635_p6 }
  0x3a   : > { %p642_p10 = por %p641_p7, %p640_p4 }
  0x3c   : > { %p643_p9 = pnand %p642_p10, %p636_p13 }
  0x3e   : > { %646 = shalt.err (!%p643_p9)
}
  0x3f   : > { %s647_s26 = scalar_lea.vmem %s906_s28, 512  ;;  %s753_s16 = smov [#allocation5]  }
  0x40   : > { %p648_p11 = scmp.ne.s32.totalorder %s906_s28, %s647_s26  ;;  %s652_s20 = sshll.u32 %s753_s16, 4  ;;  %s653_s20 = int_to_ptr.vmem [resolvable:$false] %s652_s20 }
  0x41   : > { %s654_s27 = scalar_lea.vmem %s653_s20, 1024  ;;  %p655_p8 = scmp.lt.s32.totalorder %s906_s28, %s653_s20 }
  0x42   : > { %p650_p1 = pnand %p648_p11, %p604_p3  ;;  %p656_p2 = scmp.lt.s32.totalorder %s654_s27, %s647_s26 }
  0x44   : > { %p651_p6 = pneg %p650_p1  ;;  %p657_p5 = por %p656_p2, %p655_p8 }
  0x46   : > { %p658_p4 = pnand %p657_p5, %p651_p6 }
  0x48   : > { %661 = shalt.err (!%p658_p4)
}
  0x49   : > { %526 = dma.hbm_to_vmem [thread:$0]  (!%p854_p0), %s896_s18, 512, %s906_s28, %s181_s30, %s751_s7, %s751_s7, %s752_s8  }
  0x4a   : > { %208 = sbr.rel (%p900_p12) target bundleno = 137 (0x89), region = 28  ;;  %s940_s4 = sand.u32 (!%p900_p12), 1, %s732_s10  }
  0x4b   : > { %s497_s6 = sshll.u32 (!%p900_p12), %s940_s4, 5  ;;  %s211_s29 = scalar_lea.sflag (!%p900_p12), [#allocation3], %s940_s4 }
  0x4c   : > { %s214_s5 = scalar_lea.vmem (!%p900_p12), [#allocation2], %s497_s6  ;;  %p1041_p8 = scmp.ne.s32.totalorder (!%p900_p12), %s1035_s21, 0 }
  0x51   : > { %715 = dma.done.wait (%p1041_p8), %s211_s29, 512  }
  0x52   : > { %717 = vsyncadd (%p1041_p8), %s211_s29, 4294966784  ;;  %s220_s25 = scalar_lea.sflag [#allocation6], %s940_s4  ;;  %s949_s7 = scalar_lea.vmem [#allocation5], %s497_s6 }
  0x53   : > { %719 = dma.done.wait (%p1041_p8), %s220_s25, 512  }
  0x54   : > { %721 = vsyncadd (%p1041_p8), %s220_s25, 4294966784  ;;  %v298_v0 = vlaneseq  ;;  %v264_v10 = vld [vmem:[%s214_s5] sm:$0xff]  ;;  %v265_v11 = vld [vmem:[%s214_s5 + $0x8] sm:$0xff]  ;;  %s512_s21 = smul.u32 24, %s940_s4  ;;  %s355_s15 = scalar_lea.sflag [#allocation4], %s940_s4 }
  0x55   : > { %v266_v12 = vld [vmem:[%s214_s5 + $0x10] sm:$0xff]  ;;  %v267_v14 = vld [vmem:[%s214_s5 + $0x18] sm:$0xff]  ;;  %v268_v15 = vld [vmem:[%s949_s7] sm:$0xff]  ;;  %v499_v17 = vmul.f32 -1.442695, %v264_v10  ;;  %s513_s18 = smul.u32 384, %s740_s12 }
  0x56   : > { %v299_v1 = vshrl.u32 %v298_v0, 7  ;;  %v304_v2 = vand.u32 127, %v298_v0  ;;  %v269_v16 = vld [vmem:[%s949_s7 + $0x8] sm:$0xff]  ;;  %v500_v20 = vmul.f32 -1.442695, %v265_v11  ;;  %v270_v23 = vld [vmem:[%s949_s7 + $0x10] sm:$0xff] }
  0x57   : > { %v501_v21 = vmul.f32 -1.442695, %v266_v12  ;;  %586 = vpow2.f32 %v499_v17  ;;  %v502_v24 = vmul.f32 -1.442695, %v267_v14  ;;  %v271_v27 = vld [vmem:[%s949_s7 + $0x18] sm:$0xff]  ;;  %s964_s8 = scalar_lea.vmem [#allocation7], %s512_s21  ;;  %s977_s3 = scalar_lea.hbm %s1031_s2, %s513_s18 }
  0x58   : > { %v300_v3 = vadd.s32 8, %v299_v1  ;;  %v301_v4 = vadd.s32 16, %v299_v1  ;;  %v302_v5 = vadd.s32 24, %v299_v1  ;;  %v310_v6 = vmul.u32 128, %v299_v1  ;;  %s370_s19 = sshll.u32 %s964_s8, 4  ;;  %p1042_p3 = scmp.ne.s32.totalorder %s1036_s22, 0  ;;  %s979_s19 = int_to_ptr.vmem [resolvable:$true] %s370_s19 }
  0x59   : > { %588 = vpow2.f32 %v500_v20  ;;  %s662_s26 = scalar_lea.vmem %s979_s19, 384  ;;  %s754_s12 = smov [#allocation7]  }
  0x5a   : > { %v311_v7 = vmul.u32 128, %v300_v3  ;;  %v312_v8 = vmul.u32 128, %v301_v4  ;;  %v314_v9 = vadd.s32 %v310_v6, %v304_v2  ;;  %590 = vpow2.f32 %v501_v21  ;;  %p663_p0 = scmp.ne.s32.totalorder %s979_s19, %s662_s26  ;;  %s666_s16 = sshll.u32 %s754_s12, 4  ;;  %s667_s16 = int_to_ptr.vmem [resolvable:$false] %s666_s16 }
  0x5b   : > { %v313_v13 = vmul.u32 128, %v302_v5  ;;  %592 = vpow2.f32 %v502_v24  ;;  %s668_s20 = scalar_lea.vmem %s667_s16, 768  ;;  %p669_p7 = scmp.lt.s32.totalorder %s979_s19, %s667_s16 }
  0x5c   : > { %v315_v18 = vadd.s32 %v311_v7, %v304_v2  ;;  %v316_v19 = vadd.s32 %v312_v8, %v304_v2  ;;  %vm318_vm0 = vcmp.lt.s32.totalorder %v314_v9, 256  ;;  %p664_p12 = pnand %p663_p0, %p1042_p3  ;;  %p670_p10 = scmp.lt.s32.totalorder %s668_s20, %s662_s26 }
  0x5d   : > { %v317_v22 = vadd.s32 %v313_v13, %v304_v2  ;;  %v326_v25 = vsel %vm318_vm0, %v268_v15, 0.0 }
  0x5e   : > { %vm319_vm1 = vcmp.lt.s32.totalorder %v315_v18, 256  ;;  %vm320_vm2 = vcmp.lt.s32.totalorder %v316_v19, 256  ;;  %p665_p13 = pneg %p664_p12  ;;  %p671_p9 = por %p670_p10, %p669_p7 }
  0x5f   : > { %v327_v26 = vsel %vm319_vm1, %v269_v16, 0.0  ;;  %vm321_vm3 = vcmp.lt.s32.totalorder %v317_v22, 256  ;;  %v328_v29 = vsel %vm320_vm2, %v270_v23, 0.0 }
  0x60   : > { %v340_v28 = vadd.f32 %v327_v26, %v326_v25  ;;  %v329_v31 = vsel %vm321_vm3, %v271_v27, 0.0  ;;  %p672_p11 = pnand %p671_p9, %p665_p13 }
  0x61   : > { %v587_v33 = vpop.eup %586 }
  0x62   : > { %v341_v30 = vadd.f32 %v340_v28, %v328_v29  ;;  %v284_v35 = vadd.f32 1.0, %v587_v33 }
  0x63   : > { %v589_v34 = vpop.eup %588 }
  0x64   : > { %v342_v32 = vadd.f32 %v341_v30, %v329_v31  ;;  %v591_v36 = vpop.eup %590  ;;  %v285_v37 = vadd.f32 1.0, %v589_v34  ;;  %594 = vrcp.f32 %v284_v35 }
  0x65   : > { %v593_v38 = vpop.eup %592  ;;  %v286_v39 = vadd.f32 1.0, %v591_v36 }
  0x66   : > { %506 = vst [vmem:[%s964_s8 + $0x10] sm:$0xff] %v342_v32  ;;  %v287_v40 = vadd.f32 1.0, %v593_v38  ;;  %596 = vrcp.f32 %v285_v37 }
  0x67   : > { %598 = vrcp.f32 %v286_v39 }
  0x68   : > { %600 = vrcp.f32 %v287_v40 }
  0x6e   : > { %v595_v41 = vpop.eup %594 }
  0x6f   : > { %v322_v43 = vsel %vm318_vm0, %v595_v41, 0.0 }
  0x70   : > { %v597_v42 = vpop.eup %596  ;;  %v330_v46 = vmul.f32 %v326_v25, %v322_v43 }
  0x71   : > { %v599_v44 = vpop.eup %598  ;;  %v323_v45 = vsel %vm319_vm1, %v597_v42, 0.0 }
  0x72   : > { %v601_v47 = vpop.eup %600  ;;  %v324_v48 = vsel %vm320_vm2, %v599_v44, 0.0  ;;  %v331_v49 = vmul.f32 %v327_v26, %v323_v45  ;;  %v337_v50 = vadd.f32 %v323_v45, %v322_v43 }
  0x73   : > { %v325_v51 = vsel %vm321_vm3, %v601_v47, 0.0  ;;  %v332_v52 = vmul.f32 %v328_v29, %v324_v48 }
  0x74   : > { %v333_v53 = vmul.f32 %v329_v31, %v325_v51  ;;  %v334_v54 = vadd.f32 %v331_v49, %v330_v46  ;;  %v338_v55 = vadd.f32 %v337_v50, %v324_v48 }
  0x76   : > { %v335_v56 = vadd.f32 %v334_v54, %v332_v52  ;;  %v339_v57 = vadd.f32 %v338_v55, %v325_v51 }
  0x78   : > { %v336_v58 = vadd.f32 %v335_v56, %v333_v53  ;;  %504 = vst [vmem:[%s964_s8 + $0x8] sm:$0xff] %v339_v57 }
  0x7a   : > { %345 = vst [vmem:[%s964_s8] sm:$0xff] %v336_v58 }
  0x7b   : > { %675 = shalt.err (!%p672_p11)
}
  0x7c   : > { %s676_s27 = scalar_lea.hbm %s977_s3, 384  ;;  %s680_s5 = scalar_lea.hbm %s1031_s2, 768 }
  0x7d   : > { %p677_p1 = scmp.ne.s32.totalorder %s977_s3, %s676_s27  ;;  %p681_p5 = scmp.lt.u32.totalorder %s977_s3, %s1031_s2 }
  0x7e   : > { %p682_p4 = scmp.lt.u32.totalorder %s680_s5, %s676_s27  ;;  %p684_p0 = scmp.lt.u32.totalorder %s676_s27, %s977_s3 }
  0x7f   : > { %p678_p6 = pnand %p677_p1, %p1042_p3 }
  0x80   : > { %p683_p8 = por %p682_p4, %p681_p5 }
  0x81   : > { %p679_p2 = pneg %p678_p6 }
  0x82   : > { %p685_p12 = por %p684_p0, %p683_p8 }
  0x84   : > { %p686_p13 = pnand %p685_p12, %p679_p2 }
  0x86   : > { %689 = shalt.err (!%p686_p13)
}
  0x87   : > { %s755_s21 = smov 128   ;;  %s756_s8 = smov 8  }
  0x88   : > { %518 = dma.vmem_to_hbm [thread:$0]  (%p1042_p3), %s979_s19, 384, %s977_s3, %s355_s15, %s755_s21, %s755_s21, %s756_s8  }
  0x89 PF: > { %s385_s18 = sand.u32 1, %s728_s9   ;;  %p1043_p7 = scmp.ne.s32.totalorder %s1037_s24, 0 }
  0x8a   : > { %p1044_p10 = scmp.ge.s32.totalorder %s748_s14, 2  ;;  %s386_s28 = scalar_lea.sflag [#allocation4], %s385_s18 }
  0x8c   : > { %p528_p9 = pnand %p1044_p10, %p1043_p7 }
  0x8e   : > { %723 = dma.done.wait (!%p528_p9), %s386_s28, 384  }
  0x8f   : > { %725 = vsyncadd (!%p528_p9), %s386_s28, 4294966912  ;;  %s21_s14 = sadd.s32 1, %s748_s14   ;;  %s1045_s9 = smov %s732_s10 }
  0x90   : > { %p18_p11 = scmp.ge.s32.totalorder %s21_s14, 4   ;;  %s1046_s10 = smov %s736_s11 }
  0x91   : > { %s1047_s11 = smov %s828_s23  ;;  %s1048_s12 = smov %s744_s13 }
  0x92   : > { %s1049_s13 = smov %s1051_s17  ;;  %20 = sbr.rel (!%p18_p11) target bundleno = 8 (0x8), region = 92 }
  0x99   :  { %391 = vsyncpa [#allocation3], 1 }
  0x9a   :  { %393 = vsyncpa [#allocation3 + $0x1], 1 }
  0x9b   :  { %394 = vsyncpa [#allocation6], 1 }
  0x9c   :  { %396 = vsyncpa [#allocation6 + $0x1], 1 }
  0x9d   :  { %397 = vsyncpa [#allocation4], 1 }
  0x9e   :  { %399 = vsyncpa [#allocation4 + $0x1], 1 }

</bundles_post_ra>
